<compile_context>
chip_gen: v7x
topology: tpu7x:2x2x1
jax: 0.10.0
libtpu: 0.0.40
codegen_flags: <defaults>
</compile_context>

<pallas_src>
import math

import jax
import jax.numpy as jnp
from jax.experimental import pallas as pl
from jax.experimental.pallas import tpu as pltpu

LOG_2PI = math.log(2.0 * math.pi)

_GELU_C1 = math.sqrt(2.0 / math.pi)
_GELU_C2 = 0.044715 * math.sqrt(2.0 / math.pi)


def _round_up(x, m):
    return (x + m - 1) // m * m


# ---------- elementwise helpers (f32) --------------------------------------------------------

def _gelu_tanh(x):
    # tanh-approximate GELU with pre-folded constants (5 mul + 2 add on the VPU, tanh -> EUP).
    u = x * (_GELU_C1 + _GELU_C2 * (x * x))
    return x * (0.5 + 0.5 * jnp.tanh(u))


def _layer_norm_1pass(x, gamma, beta, eps=1e-5):
    # Single-pass LN: mean and mean-of-squares in one sweep, rsqrt on the EUP, no divides.
    inv_h = 1.0 / x.shape[-1]
    m1 = jnp.sum(x, axis=-1, keepdims=True) * inv_h
    m2 = jnp.sum(x * x, axis=-1, keepdims=True) * inv_h
    var = m2 - m1 * m1
    s = jax.lax.rsqrt(var + eps)
    return (x - m1) * (s * gamma) + beta


# ---------- Pallas kernel ---------------------------------------------------------------------

def _next_goal_kernel(z_ref, eps_ref,
                      w_in_ref, b_in_ref,
                      w1s_ref, b1s_ref, w2s_ref, b2s_ref,
                      ln_g_ref, ln_b_ref,
                      w_head_ref, b_head_ref,
                      std_ref, lp_const_ref,
                      out_ref):
    n_blocks = w1s_ref.shape[0]
    E = z_ref.shape[1]                       # logical encoding dim (log_prob goes in lane E)

    def mm(x, w):
        # bf16 operands -> native single-pass MXU; accumulate in f32.
        return jnp.dot(x.astype(jnp.bfloat16), w, preferred_element_type=jnp.float32)

    # input_proj + GELU
    x = _gelu_tanh(mm(z_ref[...], w_in_ref[...]) + b_in_ref[...])

    # residual MLP blocks + post-LayerNorm (statically unrolled: n_blocks is small)
    for i in range(n_blocks):
        res = x
        h = _gelu_tanh(mm(x, w1s_ref[i]) + b1s_ref[i])
        h = _gelu_tanh(mm(h, w2s_ref[i]) + b2s_ref[i])
        x = _layer_norm_1pass(res + h, ln_g_ref[i], ln_b_ref[i])

    # fused (output_proj @ mean) head; weight/bias zero-padded to OUT_W lanes.
    mean_pad = mm(x, w_head_ref[...]) + b_head_ref[...]          # (TB, OUT_W)

    # eps work stays at E lanes (unpadded stream).
    eps = eps_ref[...]                                           # (TB, E)
    noise = std_ref[...] * eps                                   # rsample noise, (TB, E)
    # Normal(mean, std).log_prob(z_next).sum(-1); z_next - mean == std*eps exactly, so
    # log_prob = -0.5*sum(eps^2) + lp_const with lp_const = -sum(log_std) - 0.5*E*log(2*pi).
    logp = -0.5 * jnp.sum(eps * eps, axis=-1, keepdims=True) + lp_const_ref[0]   # (TB, 1)

    # Packed lane-dense output: full 128-lane unmasked store (mean in [0,E), logp in lane E),
    # then a tiny E-lane overwrite adds the noise -> no in-kernel lane widening needed.
    lane = jax.lax.broadcasted_iota(jnp.int32, mean_pad.shape, 1)
    out_ref[...] = jnp.where(lane == E, logp, mean_pad)
    out_ref[:, :E] = mean_pad[:, :E] + noise                     # z_next = mean + std*eps


# ---------- wrapper ---------------------------------------------------------------------------

def next_goal_forward(params, z_t, eps):
    B, E = z_t.shape
    H = params["w_in"].shape[1]
    n_blocks = params["w1s"].shape[0]

    OUT_W = _round_up(E + 1, 128)            # lane-dense packed output width
    # >= 2 grid steps whenever B >= 16 so both v7x TensorCores get work; cap at 256 rows/tile
    # (activations + double-buffered eps/out stay ~2 MB, far under VMEM on all generations).
    TB = min(_round_up(max(pl.cdiv(B, 2), 1), 8), 256)
    B_pad = _round_up(B, TB)

    # --- one-time parameter prep (cheap XLA ops, amortized / fused by jit) ---
    w_head = params["w_out"] @ params["w_mean"]                          # (H, E)
    b_head = params["b_out"] @ params["w_mean"] + params["b_mean"]       # (1, E)
    std = jnp.exp(params["log_std"])                                     # (1, E)
    lp_const = jnp.reshape(-jnp.sum(params["log_std"]) - 0.5 * E * LOG_2PI, (1,))

    w_in_bf = params["w_in"].astype(jnp.bfloat16)
    w1s_bf = params["w1s"].astype(jnp.bfloat16)
    w2s_bf = params["w2s"].astype(jnp.bfloat16)
    w_head_bf = jnp.pad(w_head, ((0, 0), (0, OUT_W - E))).astype(jnp.bfloat16)   # (H, OUT_W)
    b_head_p = jnp.pad(b_head, ((0, 0), (0, OUT_W - E)))

    # batch-pad only; eps/z are NOT lane-padded (padded rows are zero and discarded).
    z_p = jnp.pad(z_t, ((0, B_pad - B), (0, 0)))
    eps_p = jnp.pad(eps, ((0, B_pad - B), (0, 0)))

    batch2 = lambda i: (i, 0)
    whole2 = lambda i: (0, 0)
    whole3 = lambda i: (0, 0, 0)

    # NOTE(synk): constant-index weight operands total ~220 KB; even double-buffered they are
    # <0.5% of VMEM on every generation (incl. v7x's 64 MiB), so pl.Buffered(1) single-buffering
    # is intentionally omitted here to keep the lowering maximally portable.
    # NOTE(synk): z/eps are kept as two tiny (TB,E) DMAs instead of one packed slab -- packing
    # would need an extra wrapper-side materialization (extra HBM traffic at large B).
    in_specs = [
        pl.BlockSpec((TB, E), batch2),                 # z_t
        pl.BlockSpec((TB, E), batch2),                 # eps (unpadded lanes)
        pl.BlockSpec((E, H), whole2),                  # w_in (bf16)
        pl.BlockSpec((1, H), whole2),                  # b_in
        pl.BlockSpec((n_blocks, H, H), whole3),        # w1s (bf16)
        pl.BlockSpec((n_blocks, 1, H), whole3),        # b1s
        pl.BlockSpec((n_blocks, H, H), whole3),        # w2s (bf16)
        pl.BlockSpec((n_blocks, 1, H), whole3),        # b2s
        pl.BlockSpec((n_blocks, 1, H), whole3),        # ln gamma
        pl.BlockSpec((n_blocks, 1, H), whole3),        # ln beta
        pl.BlockSpec((H, OUT_W), whole2),              # fused head weight (bf16)
        pl.BlockSpec((1, OUT_W), whole2),              # fused head bias
        pl.BlockSpec((1, E), whole2),                  # std = exp(log_std)
        pl.BlockSpec(memory_space=pltpu.MemorySpace.SMEM),   # lp_const scalar
    ]

    # Advisory cost estimate (real per-call numbers) so XLA schedules the call correctly.
    flops = 2 * B_pad * (E * H + 2 * n_blocks * H * H + H * OUT_W)
    transcendentals = B_pad * (H * (1 + 2 * n_blocks) + n_blocks)      # tanh + rsqrt
    weight_bytes = 2 * (E * H + 2 * n_blocks * H * H + H * OUT_W) \
        + 4 * (H * (1 + 4 * n_blocks) + OUT_W + E + 1)
    bytes_accessed = 4 * (2 * B_pad * E + B_pad * OUT_W) + weight_bytes

    out = pl.pallas_call(
        _next_goal_kernel,
        grid=(B_pad // TB,),
        out_shape=jax.ShapeDtypeStruct((B_pad, OUT_W), jnp.float32),
        in_specs=in_specs,
        out_specs=pl.BlockSpec((TB, OUT_W), batch2),
        compiler_params=pltpu.CompilerParams(dimension_semantics=("parallel",)),
        cost_estimate=pl.CostEstimate(flops=flops, transcendentals=transcendentals,
                                      bytes_accessed=bytes_accessed),
    )(z_p, eps_p,
      w_in_bf, params["b_in"],
      w1s_bf, params["b1s"], w2s_bf, params["b2s"],
      params["ln_g"], params["ln_b"],
      w_head_bf, b_head_p, std, lp_const)

    z_next = out[:B, :E]
    log_prob = out[:B, E]
    return z_next, log_prob


# ---------- parameter init (matches the PyTorch module's init) --------------------------------

def init_params(key, encoding_dim, hidden_dim, num_layers):
    n_blocks = (num_layers - 2) // 2

    def kaiming(k, fan_in, fan_out):
        # torch kaiming_normal_(mode='fan_out', nonlinearity='relu') on a (out,in) weight,
        # stored transposed as [in, out] for x @ W.
        std = math.sqrt(2.0 / fan_out)
        w = jax.random.normal(k, (fan_out, fan_in), jnp.float32) * std
        return jnp.transpose(w)

    keys = iter(jax.random.split(key, 3 + 2 * n_blocks))
    E, H = encoding_dim, hidden_dim
    params = {
        "w_in": kaiming(next(keys), E, H),
        "b_in": jnp.zeros((1, H), jnp.float32),
        "w1s": jnp.stack([kaiming(next(keys), H, H) for _ in range(n_blocks)]),
        "b1s": jnp.zeros((n_blocks, 1, H), jnp.float32),
        "w2s": jnp.stack([kaiming(next(keys), H, H) for _ in range(n_blocks)]),
        "b2s": jnp.zeros((n_blocks, 1, H), jnp.float32),
        "ln_g": jnp.ones((n_blocks, 1, H), jnp.float32),
        "ln_b": jnp.zeros((n_blocks, 1, H), jnp.float32),
        "w_out": kaiming(next(keys), H, E),
        "b_out": jnp.zeros((1, E), jnp.float32),
        "w_mean": kaiming(next(keys), E, E),
        "b_mean": jnp.zeros((1, E), jnp.float32),
        "log_std": jnp.zeros((1, E), jnp.float32),
    }
    # TODO(synk): value_mlp is defined in __init__ but unused by forward(); omitted here.
    return params


# ---------- pure-JAX f32 reference (faithful to the PyTorch forward) ---------------------------

def reference_forward(params, z_t, eps):
    gelu = lambda x: jax.nn.gelu(x, approximate=False)   # torch nn.GELU() default (erf)

    def ln(x, g, b, e=1e-5):
        mu = jnp.mean(x, axis=-1, keepdims=True)
        var = jnp.mean((x - mu) ** 2, axis=-1, keepdims=True)
        return (x - mu) / jnp.sqrt(var + e) * g + b

    x = gelu(z_t @ params["w_in"] + params["b_in"])
    for i in range(params["w1s"].shape[0]):
        r = x
        x = gelu(x @ params["w1s"][i] + params["b1s"][i])
        x = gelu(x @ params["w2s"][i] + params["b2s"][i])
        x = ln(x + r, params["ln_g"][i], params["ln_b"][i])
    x = x @ params["w_out"] + params["b_out"]
    mean = x @ params["w_mean"] + params["b_mean"]
    std = jnp.exp(params["log_std"])
    z_next = mean + std * eps
    lp = jnp.sum(-((z_next - mean) ** 2) / (2.0 * std * std)
                 - params["log_std"] - 0.5 * LOG_2PI, axis=-1)
    return z_next, lp


# ---------- main -------------------------------------------------------------------------------

if __name__ == "__main__":
    B, ENC, HID, LAYERS = 8, 32, 128, 6   # (num_layers-2)//2 = 2 residual blocks

    key = jax.random.PRNGKey(0)
    k_params, k_z, k_eps = jax.random.split(key, 3)

    params = init_params(k_params, ENC, HID, LAYERS)
    z_t = jax.random.normal(k_z, (B, ENC), jnp.float32)
    # TODO(synk): torch rsample() draws from torch's RNG; here the Gaussian noise is drawn
    # with jax.random and fed into the kernel (same math, different random stream).
    eps = jax.random.normal(k_eps, (B, ENC), jnp.float32)

    fwd = jax.jit(next_goal_forward)
    z_next, log_prob = fwd(params, z_t, eps)
    jax.block_until_ready((z_next, log_prob))

    z_ref, lp_ref = reference_forward(params, z_t, eps)
    assert z_next.shape == (B, ENC) and log_prob.shape == (B,)

    # bf16 MXU matmuls + tanh-GELU vs an exact-erf f32 reference: require max abs error
    # <= 2% of the output dynamic range (standard bf16 validation criterion).
    z_err = float(jnp.max(jnp.abs(z_next - z_ref)))
    lp_err = float(jnp.max(jnp.abs(log_prob - lp_ref)))
    z_scale = max(1.0, float(jnp.max(jnp.abs(z_ref))))
    lp_scale = max(1.0, float(jnp.max(jnp.abs(lp_ref))))
    assert z_err <= 2e-2 * z_scale, f"z_next mismatch: err={z_err}, scale={z_scale}"
    assert lp_err <= 2e-2 * lp_scale, f"log_prob mismatch: err={lp_err}, scale={lp_scale}"

    print("KERNEL_OK")
</pallas_src>

<mosaic_0001>
module attributes {stable_mosaic.version = 11 : i64} {
  func.func @_next_goal_kernel(%arg0: i32, %arg1: memref<8x32xf32, #tpu.memory_space<vmem>>, %arg2: memref<8x32xf32, #tpu.memory_space<vmem>>, %arg3: memref<32x128xbf16, #tpu.memory_space<vmem>>, %arg4: memref<1x128xf32, #tpu.memory_space<vmem>>, %arg5: memref<2x128x128xbf16, #tpu.memory_space<vmem>>, %arg6: memref<2x1x128xf32, #tpu.memory_space<vmem>>, %arg7: memref<2x128x128xbf16, #tpu.memory_space<vmem>>, %arg8: memref<2x1x128xf32, #tpu.memory_space<vmem>>, %arg9: memref<2x1x128xf32, #tpu.memory_space<vmem>>, %arg10: memref<2x1x128xf32, #tpu.memory_space<vmem>>, %arg11: memref<128x128xbf16, #tpu.memory_space<vmem>>, %arg12: memref<1x128xf32, #tpu.memory_space<vmem>>, %arg13: memref<1x32xf32, #tpu.memory_space<vmem>>, %arg14: memref<1xf32, #tpu.memory_space<smem>>, %arg15: memref<8x128xf32, #tpu.memory_space<vmem>>) attributes {dimension_semantics = [#tpu.dimension_semantics<parallel>], iteration_bounds = array<i64: 1>, scalar_prefetch = 0 : i64, scratch_operands = 0 : i64, tpu.core_type = #tpu.core_type<tc>, window_params = [{transform_indices = @transform_0, window_bounds = array<i64: 8, 32>}, {transform_indices = @transform_1, window_bounds = array<i64: 8, 32>}, {pipeline_mode = #tpu.pipeline_mode<synchronous>, transform_indices = @transform_2, window_bounds = array<i64: 32, 128>}, {pipeline_mode = #tpu.pipeline_mode<synchronous>, transform_indices = @transform_3, window_bounds = array<i64: 1, 128>}, {pipeline_mode = #tpu.pipeline_mode<synchronous>, transform_indices = @transform_4, window_bounds = array<i64: 2, 128, 128>}, {pipeline_mode = #tpu.pipeline_mode<synchronous>, transform_indices = @transform_5, window_bounds = array<i64: 2, 1, 128>}, {pipeline_mode = #tpu.pipeline_mode<synchronous>, transform_indices = @transform_6, window_bounds = array<i64: 2, 128, 128>}, {pipeline_mode = #tpu.pipeline_mode<synchronous>, transform_indices = @transform_7, window_bounds = array<i64: 2, 1, 128>}, {pipeline_mode = #tpu.pipeline_mode<synchronous>, transform_indices = @transform_8, window_bounds = array<i64: 2, 1, 128>}, {pipeline_mode = #tpu.pipeline_mode<synchronous>, transform_indices = @transform_9, window_bounds = array<i64: 2, 1, 128>}, {pipeline_mode = #tpu.pipeline_mode<synchronous>, transform_indices = @transform_10, window_bounds = array<i64: 128, 128>}, {pipeline_mode = #tpu.pipeline_mode<synchronous>, transform_indices = @transform_11, window_bounds = array<i64: 1, 128>}, {pipeline_mode = #tpu.pipeline_mode<synchronous>, transform_indices = @transform_12, window_bounds = array<i64: 1, 32>}, {transform_indices = @transform_13, window_bounds = array<i64: 1>}, {transform_indices = @transform_14, window_bounds = array<i64: 8, 128>}]} {
    %c0 = arith.constant 0 : index
    %c0_0 = arith.constant 0 : index
    %0 = vector.load %arg1[%c0, %c0_0] : memref<8x32xf32, #tpu.memory_space<vmem>>, vector<8x32xf32>
    %c0_1 = arith.constant 0 : index
    %c0_2 = arith.constant 0 : index
    %1 = vector.load %arg3[%c0_1, %c0_2] : memref<32x128xbf16, #tpu.memory_space<vmem>>, vector<32x128xbf16>
    %2 = arith.truncf %0 : vector<8x32xf32> to vector<8x32xbf16>
    %cst = arith.constant dense<0.000000e+00> : vector<8x128xf32>
    %3 = tpu.matmul %2, %1, %cst {dimension_numbers = #tpu.dot_dimension_numbers<[1], [0], [0], [1], [0, 0, 1, 1], [], []>} : vector<8x32xbf16>, vector<32x128xbf16>, vector<8x128xf32> -> vector<8x128xf32>
    %c0_3 = arith.constant 0 : index
    %c0_4 = arith.constant 0 : index
    %4 = vector.load %arg4[%c0_3, %c0_4] : memref<1x128xf32, #tpu.memory_space<vmem>>, vector<1x128xf32>
    %5 = vector.broadcast %4 : vector<1x128xf32> to vector<8x128xf32>
    %6 = arith.addf %3, %5 : vector<8x128xf32>
    %7 = arith.mulf %6, %6 : vector<8x128xf32>
    %cst_5 = arith.constant 0.0356774069 : f32
    %8 = vector.broadcast %cst_5 : f32 to vector<8x128xf32>
    %9 = arith.mulf %8, %7 : vector<8x128xf32>
    %cst_6 = arith.constant 0.797884583 : f32
    %10 = vector.broadcast %cst_6 : f32 to vector<8x128xf32>
    %11 = arith.addf %10, %9 : vector<8x128xf32>
    %12 = arith.mulf %6, %11 : vector<8x128xf32>
    %13 = math.tanh %12 : vector<8x128xf32>
    %cst_7 = arith.constant 5.000000e-01 : f32
    %14 = vector.broadcast %cst_7 : f32 to vector<8x128xf32>
    %15 = arith.mulf %14, %13 : vector<8x128xf32>
    %cst_8 = arith.constant 5.000000e-01 : f32
    %16 = vector.broadcast %cst_8 : f32 to vector<8x128xf32>
    %17 = arith.addf %16, %15 : vector<8x128xf32>
    %18 = arith.mulf %6, %17 : vector<8x128xf32>
    %c0_9 = arith.constant 0 : index
    %c0_10 = arith.constant 0 : index
    %c0_11 = arith.constant 0 : index
    %19 = vector.load %arg5[%c0_9, %c0_10, %c0_11] : memref<2x128x128xbf16, #tpu.memory_space<vmem>>, vector<1x128x128xbf16>
    %20 = vector.shape_cast %19 : vector<1x128x128xbf16> to vector<128x128xbf16>
    %21 = arith.truncf %18 : vector<8x128xf32> to vector<8x128xbf16>
    %cst_12 = arith.constant dense<0.000000e+00> : vector<8x128xf32>
    %22 = tpu.matmul %21, %20, %cst_12 {dimension_numbers = #tpu.dot_dimension_numbers<[1], [0], [0], [1], [0, 0, 1, 1], [], []>} : vector<8x128xbf16>, vector<128x128xbf16>, vector<8x128xf32> -> vector<8x128xf32>
    %c0_13 = arith.constant 0 : index
    %c0_14 = arith.constant 0 : index
    %c0_15 = arith.constant 0 : index
    %23 = vector.load %arg6[%c0_13, %c0_14, %c0_15] : memref<2x1x128xf32, #tpu.memory_space<vmem>>, vector<1x1x128xf32>
    %24 = vector.shape_cast %23 : vector<1x1x128xf32> to vector<1x128xf32>
    %25 = vector.broadcast %24 : vector<1x128xf32> to vector<8x128xf32>
    %26 = arith.addf %22, %25 : vector<8x128xf32>
    %27 = arith.mulf %26, %26 : vector<8x128xf32>
    %cst_16 = arith.constant 0.0356774069 : f32
    %28 = vector.broadcast %cst_16 : f32 to vector<8x128xf32>
    %29 = arith.mulf %28, %27 : vector<8x128xf32>
    %cst_17 = arith.constant 0.797884583 : f32
    %30 = vector.broadcast %cst_17 : f32 to vector<8x128xf32>
    %31 = arith.addf %30, %29 : vector<8x128xf32>
    %32 = arith.mulf %26, %31 : vector<8x128xf32>
    %33 = math.tanh %32 : vector<8x128xf32>
    %cst_18 = arith.constant 5.000000e-01 : f32
    %34 = vector.broadcast %cst_18 : f32 to vector<8x128xf32>
    %35 = arith.mulf %34, %33 : vector<8x128xf32>
    %cst_19 = arith.constant 5.000000e-01 : f32
    %36 = vector.broadcast %cst_19 : f32 to vector<8x128xf32>
    %37 = arith.addf %36, %35 : vector<8x128xf32>
    %38 = arith.mulf %26, %37 : vector<8x128xf32>
    %c0_20 = arith.constant 0 : index
    %c0_21 = arith.constant 0 : index
    %c0_22 = arith.constant 0 : index
    %39 = vector.load %arg7[%c0_20, %c0_21, %c0_22] : memref<2x128x128xbf16, #tpu.memory_space<vmem>>, vector<1x128x128xbf16>
    %40 = vector.shape_cast %39 : vector<1x128x128xbf16> to vector<128x128xbf16>
    %41 = arith.truncf %38 : vector<8x128xf32> to vector<8x128xbf16>
    %cst_23 = arith.constant dense<0.000000e+00> : vector<8x128xf32>
    %42 = tpu.matmul %41, %40, %cst_23 {dimension_numbers = #tpu.dot_dimension_numbers<[1], [0], [0], [1], [0, 0, 1, 1], [], []>} : vector<8x128xbf16>, vector<128x128xbf16>, vector<8x128xf32> -> vector<8x128xf32>
    %c0_24 = arith.constant 0 : index
    %c0_25 = arith.constant 0 : index
    %c0_26 = arith.constant 0 : index
    %43 = vector.load %arg8[%c0_24, %c0_25, %c0_26] : memref<2x1x128xf32, #tpu.memory_space<vmem>>, vector<1x1x128xf32>
    %44 = vector.shape_cast %43 : vector<1x1x128xf32> to vector<1x128xf32>
    %45 = vector.broadcast %44 : vector<1x128xf32> to vector<8x128xf32>
    %46 = arith.addf %42, %45 : vector<8x128xf32>
    %47 = arith.mulf %46, %46 : vector<8x128xf32>
    %cst_27 = arith.constant 0.0356774069 : f32
    %48 = vector.broadcast %cst_27 : f32 to vector<8x128xf32>
    %49 = arith.mulf %48, %47 : vector<8x128xf32>
    %cst_28 = arith.constant 0.797884583 : f32
    %50 = vector.broadcast %cst_28 : f32 to vector<8x128xf32>
    %51 = arith.addf %50, %49 : vector<8x128xf32>
    %52 = arith.mulf %46, %51 : vector<8x128xf32>
    %53 = math.tanh %52 : vector<8x128xf32>
    %cst_29 = arith.constant 5.000000e-01 : f32
    %54 = vector.broadcast %cst_29 : f32 to vector<8x128xf32>
    %55 = arith.mulf %54, %53 : vector<8x128xf32>
    %cst_30 = arith.constant 5.000000e-01 : f32
    %56 = vector.broadcast %cst_30 : f32 to vector<8x128xf32>
    %57 = arith.addf %56, %55 : vector<8x128xf32>
    %58 = arith.mulf %46, %57 : vector<8x128xf32>
    %59 = arith.addf %18, %58 : vector<8x128xf32>
    %c0_31 = arith.constant 0 : index
    %c0_32 = arith.constant 0 : index
    %c0_33 = arith.constant 0 : index
    %60 = vector.load %arg9[%c0_31, %c0_32, %c0_33] : memref<2x1x128xf32, #tpu.memory_space<vmem>>, vector<1x1x128xf32>
    %61 = vector.shape_cast %60 : vector<1x1x128xf32> to vector<1x128xf32>
    %c0_34 = arith.constant 0 : index
    %c0_35 = arith.constant 0 : index
    %c0_36 = arith.constant 0 : index
    %62 = vector.load %arg10[%c0_34, %c0_35, %c0_36] : memref<2x1x128xf32, #tpu.memory_space<vmem>>, vector<1x1x128xf32>
    %63 = vector.shape_cast %62 : vector<1x1x128xf32> to vector<1x128xf32>
    %cst_37 = arith.constant dense<0.000000e+00> : vector<8xf32>
    %64 = vector.multi_reduction <add>, %59, %cst_37 [1] : vector<8x128xf32> to vector<8xf32>
    %65 = vector.shape_cast %64 : vector<8xf32> to vector<8x1xf32>
    %cst_38 = arith.constant 7.812500e-03 : f32
    %66 = vector.broadcast %cst_38 : f32 to vector<8x1xf32>
    %67 = arith.mulf %65, %66 : vector<8x1xf32>
    %68 = arith.mulf %59, %59 : vector<8x128xf32>
    %cst_39 = arith.constant dense<0.000000e+00> : vector<8xf32>
    %69 = vector.multi_reduction <add>, %68, %cst_39 [1] : vector<8x128xf32> to vector<8xf32>
    %70 = vector.shape_cast %69 : vector<8xf32> to vector<8x1xf32>
    %cst_40 = arith.constant 7.812500e-03 : f32
    %71 = vector.broadcast %cst_40 : f32 to vector<8x1xf32>
    %72 = arith.mulf %70, %71 : vector<8x1xf32>
    %73 = arith.mulf %67, %67 : vector<8x1xf32>
    %74 = arith.subf %72, %73 : vector<8x1xf32>
    %cst_41 = arith.constant 9.99999974E-6 : f32
    %75 = vector.broadcast %cst_41 : f32 to vector<8x1xf32>
    %76 = arith.addf %74, %75 : vector<8x1xf32>
    %77 = math.rsqrt %76 : vector<8x1xf32>
    %78 = vector.broadcast %67 : vector<8x1xf32> to vector<8x128xf32>
    %79 = arith.subf %59, %78 : vector<8x128xf32>
    %80 = vector.broadcast %77 : vector<8x1xf32> to vector<8x128xf32>
    %81 = vector.broadcast %61 : vector<1x128xf32> to vector<8x128xf32>
    %82 = arith.mulf %80, %81 : vector<8x128xf32>
    %83 = arith.mulf %79, %82 : vector<8x128xf32>
    %84 = vector.broadcast %63 : vector<1x128xf32> to vector<8x128xf32>
    %85 = arith.addf %83, %84 : vector<8x128xf32>
    %c1 = arith.constant 1 : index
    %c0_42 = arith.constant 0 : index
    %c0_43 = arith.constant 0 : index
    %86 = vector.load %arg5[%c1, %c0_42, %c0_43] : memref<2x128x128xbf16, #tpu.memory_space<vmem>>, vector<1x128x128xbf16>
    %87 = vector.shape_cast %86 : vector<1x128x128xbf16> to vector<128x128xbf16>
    %88 = arith.truncf %85 : vector<8x128xf32> to vector<8x128xbf16>
    %cst_44 = arith.constant dense<0.000000e+00> : vector<8x128xf32>
    %89 = tpu.matmul %88, %87, %cst_44 {dimension_numbers = #tpu.dot_dimension_numbers<[1], [0], [0], [1], [0, 0, 1, 1], [], []>} : vector<8x128xbf16>, vector<128x128xbf16>, vector<8x128xf32> -> vector<8x128xf32>
    %c1_45 = arith.constant 1 : index
    %c0_46 = arith.constant 0 : index
    %c0_47 = arith.constant 0 : index
    %90 = vector.load %arg6[%c1_45, %c0_46, %c0_47] : memref<2x1x128xf32, #tpu.memory_space<vmem>>, vector<1x1x128xf32>
    %91 = vector.shape_cast %90 : vector<1x1x128xf32> to vector<1x128xf32>
    %92 = vector.broadcast %91 : vector<1x128xf32> to vector<8x128xf32>
    %93 = arith.addf %89, %92 : vector<8x128xf32>
    %94 = arith.mulf %93, %93 : vector<8x128xf32>
    %cst_48 = arith.constant 0.0356774069 : f32
    %95 = vector.broadcast %cst_48 : f32 to vector<8x128xf32>
    %96 = arith.mulf %95, %94 : vector<8x128xf32>
    %cst_49 = arith.constant 0.797884583 : f32
    %97 = vector.broadcast %cst_49 : f32 to vector<8x128xf32>
    %98 = arith.addf %97, %96 : vector<8x128xf32>
    %99 = arith.mulf %93, %98 : vector<8x128xf32>
    %100 = math.tanh %99 : vector<8x128xf32>
    %cst_50 = arith.constant 5.000000e-01 : f32
    %101 = vector.broadcast %cst_50 : f32 to vector<8x128xf32>
    %102 = arith.mulf %101, %100 : vector<8x128xf32>
    %cst_51 = arith.constant 5.000000e-01 : f32
    %103 = vector.broadcast %cst_51 : f32 to vector<8x128xf32>
    %104 = arith.addf %103, %102 : vector<8x128xf32>
    %105 = arith.mulf %93, %104 : vector<8x128xf32>
    %c1_52 = arith.constant 1 : index
    %c0_53 = arith.constant 0 : index
    %c0_54 = arith.constant 0 : index
    %106 = vector.load %arg7[%c1_52, %c0_53, %c0_54] : memref<2x128x128xbf16, #tpu.memory_space<vmem>>, vector<1x128x128xbf16>
    %107 = vector.shape_cast %106 : vector<1x128x128xbf16> to vector<128x128xbf16>
    %108 = arith.truncf %105 : vector<8x128xf32> to vector<8x128xbf16>
    %cst_55 = arith.constant dense<0.000000e+00> : vector<8x128xf32>
    %109 = tpu.matmul %108, %107, %cst_55 {dimension_numbers = #tpu.dot_dimension_numbers<[1], [0], [0], [1], [0, 0, 1, 1], [], []>} : vector<8x128xbf16>, vector<128x128xbf16>, vector<8x128xf32> -> vector<8x128xf32>
    %c1_56 = arith.constant 1 : index
    %c0_57 = arith.constant 0 : index
    %c0_58 = arith.constant 0 : index
    %110 = vector.load %arg8[%c1_56, %c0_57, %c0_58] : memref<2x1x128xf32, #tpu.memory_space<vmem>>, vector<1x1x128xf32>
    %111 = vector.shape_cast %110 : vector<1x1x128xf32> to vector<1x128xf32>
    %112 = vector.broadcast %111 : vector<1x128xf32> to vector<8x128xf32>
    %113 = arith.addf %109, %112 : vector<8x128xf32>
    %114 = arith.mulf %113, %113 : vector<8x128xf32>
    %cst_59 = arith.constant 0.0356774069 : f32
    %115 = vector.broadcast %cst_59 : f32 to vector<8x128xf32>
    %116 = arith.mulf %115, %114 : vector<8x128xf32>
    %cst_60 = arith.constant 0.797884583 : f32
    %117 = vector.broadcast %cst_60 : f32 to vector<8x128xf32>
    %118 = arith.addf %117, %116 : vector<8x128xf32>
    %119 = arith.mulf %113, %118 : vector<8x128xf32>
    %120 = math.tanh %119 : vector<8x128xf32>
    %cst_61 = arith.constant 5.000000e-01 : f32
    %121 = vector.broadcast %cst_61 : f32 to vector<8x128xf32>
    %122 = arith.mulf %121, %120 : vector<8x128xf32>
    %cst_62 = arith.constant 5.000000e-01 : f32
    %123 = vector.broadcast %cst_62 : f32 to vector<8x128xf32>
    %124 = arith.addf %123, %122 : vector<8x128xf32>
    %125 = arith.mulf %113, %124 : vector<8x128xf32>
    %126 = arith.addf %85, %125 : vector<8x128xf32>
    %c1_63 = arith.constant 1 : index
    %c0_64 = arith.constant 0 : index
    %c0_65 = arith.constant 0 : index
    %127 = vector.load %arg9[%c1_63, %c0_64, %c0_65] : memref<2x1x128xf32, #tpu.memory_space<vmem>>, vector<1x1x128xf32>
    %128 = vector.shape_cast %127 : vector<1x1x128xf32> to vector<1x128xf32>
    %c1_66 = arith.constant 1 : index
    %c0_67 = arith.constant 0 : index
    %c0_68 = arith.constant 0 : index
    %129 = vector.load %arg10[%c1_66, %c0_67, %c0_68] : memref<2x1x128xf32, #tpu.memory_space<vmem>>, vector<1x1x128xf32>
    %130 = vector.shape_cast %129 : vector<1x1x128xf32> to vector<1x128xf32>
    %cst_69 = arith.constant dense<0.000000e+00> : vector<8xf32>
    %131 = vector.multi_reduction <add>, %126, %cst_69 [1] : vector<8x128xf32> to vector<8xf32>
    %132 = vector.shape_cast %131 : vector<8xf32> to vector<8x1xf32>
    %cst_70 = arith.constant 7.812500e-03 : f32
    %133 = vector.broadcast %cst_70 : f32 to vector<8x1xf32>
    %134 = arith.mulf %132, %133 : vector<8x1xf32>
    %135 = arith.mulf %126, %126 : vector<8x128xf32>
    %cst_71 = arith.constant dense<0.000000e+00> : vector<8xf32>
    %136 = vector.multi_reduction <add>, %135, %cst_71 [1] : vector<8x128xf32> to vector<8xf32>
    %137 = vector.shape_cast %136 : vector<8xf32> to vector<8x1xf32>
    %cst_72 = arith.constant 7.812500e-03 : f32
    %138 = vector.broadcast %cst_72 : f32 to vector<8x1xf32>
    %139 = arith.mulf %137, %138 : vector<8x1xf32>
    %140 = arith.mulf %134, %134 : vector<8x1xf32>
    %141 = arith.subf %139, %140 : vector<8x1xf32>
    %cst_73 = arith.constant 9.99999974E-6 : f32
    %142 = vector.broadcast %cst_73 : f32 to vector<8x1xf32>
    %143 = arith.addf %141, %142 : vector<8x1xf32>
    %144 = math.rsqrt %143 : vector<8x1xf32>
    %145 = vector.broadcast %134 : vector<8x1xf32> to vector<8x128xf32>
    %146 = arith.subf %126, %145 : vector<8x128xf32>
    %147 = vector.broadcast %144 : vector<8x1xf32> to vector<8x128xf32>
    %148 = vector.broadcast %128 : vector<1x128xf32> to vector<8x128xf32>
    %149 = arith.mulf %147, %148 : vector<8x128xf32>
    %150 = arith.mulf %146, %149 : vector<8x128xf32>
    %151 = vector.broadcast %130 : vector<1x128xf32> to vector<8x128xf32>
    %152 = arith.addf %150, %151 : vector<8x128xf32>
    %c0_74 = arith.constant 0 : index
    %c0_75 = arith.constant 0 : index
    %153 = vector.load %arg11[%c0_74, %c0_75] : memref<128x128xbf16, #tpu.memory_space<vmem>>, vector<128x128xbf16>
    %154 = arith.truncf %152 : vector<8x128xf32> to vector<8x128xbf16>
    %cst_76 = arith.constant dense<0.000000e+00> : vector<8x128xf32>
    %155 = tpu.matmul %154, %153, %cst_76 {dimension_numbers = #tpu.dot_dimension_numbers<[1], [0], [0], [1], [0, 0, 1, 1], [], []>} : vector<8x128xbf16>, vector<128x128xbf16>, vector<8x128xf32> -> vector<8x128xf32>
    %c0_77 = arith.constant 0 : index
    %c0_78 = arith.constant 0 : index
    %156 = vector.load %arg12[%c0_77, %c0_78] : memref<1x128xf32, #tpu.memory_space<vmem>>, vector<1x128xf32>
    %157 = vector.broadcast %156 : vector<1x128xf32> to vector<8x128xf32>
    %158 = arith.addf %155, %157 : vector<8x128xf32>
    %c0_79 = arith.constant 0 : index
    %c0_80 = arith.constant 0 : index
    %159 = vector.load %arg2[%c0_79, %c0_80] : memref<8x32xf32, #tpu.memory_space<vmem>>, vector<8x32xf32>
    %c0_81 = arith.constant 0 : index
    %c0_82 = arith.constant 0 : index
    %160 = vector.load %arg13[%c0_81, %c0_82] : memref<1x32xf32, #tpu.memory_space<vmem>>, vector<1x32xf32>
    %161 = vector.broadcast %160 : vector<1x32xf32> to vector<8x32xf32>
    %162 = arith.mulf %161, %159 : vector<8x32xf32>
    %163 = arith.mulf %159, %159 : vector<8x32xf32>
    %cst_83 = arith.constant dense<0.000000e+00> : vector<8xf32>
    %164 = vector.multi_reduction <add>, %163, %cst_83 [1] : vector<8x32xf32> to vector<8xf32>
    %165 = vector.shape_cast %164 : vector<8xf32> to vector<8x1xf32>
    %cst_84 = arith.constant -5.000000e-01 : f32
    %166 = vector.broadcast %cst_84 : f32 to vector<8x1xf32>
    %167 = arith.mulf %166, %165 : vector<8x1xf32>
    %c0_85 = arith.constant 0 : index
    %168 = memref.load %arg14[%c0_85] : memref<1xf32, #tpu.memory_space<smem>>
    %169 = vector.broadcast %168 : f32 to vector<8x1xf32>
    %170 = arith.addf %167, %169 : vector<8x1xf32>
    %171 = tpu.iota {dimensions = array<i32: 1>} : vector<8x128xi32>
    %c32_i32 = arith.constant 32 : i32
    %172 = vector.broadcast %c32_i32 : i32 to vector<8x128xi32>
    %173 = arith.cmpi eq, %171, %172 : vector<8x128xi32>
    %174 = vector.shape_cast %170 : vector<8x1xf32> to vector<8x1xf32>
    %175 = vector.broadcast %174 : vector<8x1xf32> to vector<8x128xf32>
    %176 = arith.select %173, %175, %158 : vector<8x128xi1>, vector<8x128xf32>
    %c0_86 = arith.constant 0 : index
    %c0_87 = arith.constant 0 : index
    %177 = vector.load %arg15[%c0_86, %c0_87] : memref<8x128xf32, #tpu.memory_space<vmem>>, vector<8x128xf32>
    tpu.vector_store %arg15[%c0_86, %c0_87], %176 {strides = array<i32>} : memref<8x128xf32, #tpu.memory_space<vmem>>, vector<8x128xf32>,
    %178 = vector.extract_strided_slice %158 {offsets = [0, 0], sizes = [8, 32], strides = [1, 1]} : vector<8x128xf32> to vector<8x32xf32>
    %179 = arith.addf %178, %162 : vector<8x32xf32>
    %c0_88 = arith.constant 0 : index
    %c0_89 = arith.constant 0 : index
    %180 = vector.load %arg15[%c0_88, %c0_89] : memref<8x128xf32, #tpu.memory_space<vmem>>, vector<8x32xf32>
    tpu.vector_store %arg15[%c0_88, %c0_89], %179 {strides = array<i32>} : memref<8x128xf32, #tpu.memory_space<vmem>>, vector<8x32xf32>,
    return
  }
  func.func @transform_0(%arg0: i32) -> (i32, i32) {
    %c0_i32 = arith.constant 0 : i32
    %c0_i32_0 = arith.constant 0 : i32
    return %arg0, %c0_i32 : i32, i32
  }
  func.func @transform_1(%arg0: i32) -> (i32, i32) {
    %c0_i32 = arith.constant 0 : i32
    %c0_i32_0 = arith.constant 0 : i32
    return %arg0, %c0_i32 : i32, i32
  }
  func.func @transform_2(%arg0: i32) -> (i32, i32) {
    %c0_i32 = arith.constant 0 : i32
    %c0_i32_0 = arith.constant 0 : i32
    %c0_i32_1 = arith.constant 0 : i32
    return %c0_i32, %c0_i32_0 : i32, i32
  }
  func.func @transform_3(%arg0: i32) -> (i32, i32) {
    %c0_i32 = arith.constant 0 : i32
    %c0_i32_0 = arith.constant 0 : i32
    %c0_i32_1 = arith.constant 0 : i32
    return %c0_i32, %c0_i32_0 : i32, i32
  }
  func.func @transform_4(%arg0: i32) -> (i32, i32, i32) {
    %c0_i32 = arith.constant 0 : i32
    %c0_i32_0 = arith.constant 0 : i32
    %c0_i32_1 = arith.constant 0 : i32
    %c0_i32_2 = arith.constant 0 : i32
    return %c0_i32, %c0_i32_0, %c0_i32_1 : i32, i32, i32
  }
  func.func @transform_5(%arg0: i32) -> (i32, i32, i32) {
    %c0_i32 = arith.constant 0 : i32
    %c0_i32_0 = arith.constant 0 : i32
    %c0_i32_1 = arith.constant 0 : i32
    %c0_i32_2 = arith.constant 0 : i32
    return %c0_i32, %c0_i32_0, %c0_i32_1 : i32, i32, i32
  }
  func.func @transform_6(%arg0: i32) -> (i32, i32, i32) {
    %c0_i32 = arith.constant 0 : i32
    %c0_i32_0 = arith.constant 0 : i32
    %c0_i32_1 = arith.constant 0 : i32
    %c0_i32_2 = arith.constant 0 : i32
    return %c0_i32, %c0_i32_0, %c0_i32_1 : i32, i32, i32
  }
  func.func @transform_7(%arg0: i32) -> (i32, i32, i32) {
    %c0_i32 = arith.constant 0 : i32
    %c0_i32_0 = arith.constant 0 : i32
    %c0_i32_1 = arith.constant 0 : i32
    %c0_i32_2 = arith.constant 0 : i32
    return %c0_i32, %c0_i32_0, %c0_i32_1 : i32, i32, i32
  }
  func.func @transform_8(%arg0: i32) -> (i32, i32, i32) {
    %c0_i32 = arith.constant 0 : i32
    %c0_i32_0 = arith.constant 0 : i32
    %c0_i32_1 = arith.constant 0 : i32
    %c0_i32_2 = arith.constant 0 : i32
    return %c0_i32, %c0_i32_0, %c0_i32_1 : i32, i32, i32
  }
  func.func @transform_9(%arg0: i32) -> (i32, i32, i32) {
    %c0_i32 = arith.constant 0 : i32
    %c0_i32_0 = arith.constant 0 : i32
    %c0_i32_1 = arith.constant 0 : i32
    %c0_i32_2 = arith.constant 0 : i32
    return %c0_i32, %c0_i32_0, %c0_i32_1 : i32, i32, i32
  }
  func.func @transform_10(%arg0: i32) -> (i32, i32) {
    %c0_i32 = arith.constant 0 : i32
    %c0_i32_0 = arith.constant 0 : i32
    %c0_i32_1 = arith.constant 0 : i32
    return %c0_i32, %c0_i32_0 : i32, i32
  }
  func.func @transform_11(%arg0: i32) -> (i32, i32) {
    %c0_i32 = arith.constant 0 : i32
    %c0_i32_0 = arith.constant 0 : i32
    %c0_i32_1 = arith.constant 0 : i32
    return %c0_i32, %c0_i32_0 : i32, i32
  }
  func.func @transform_12(%arg0: i32) -> (i32, i32) {
    %c0_i32 = arith.constant 0 : i32
    %c0_i32_0 = arith.constant 0 : i32
    %c0_i32_1 = arith.constant 0 : i32
    return %c0_i32, %c0_i32_0 : i32, i32
  }
  func.func @transform_13(%arg0: i32) -> i32 {
    %c0_i32 = arith.constant 0 : i32
    %c0_i32_0 = arith.constant 0 : i32
    return %c0_i32 : i32
  }
  func.func @transform_14(%arg0: i32) -> (i32, i32) {
    %c0_i32 = arith.constant 0 : i32
    %c0_i32_0 = arith.constant 0 : i32
    return %arg0, %c0_i32 : i32, i32
  }
}

</mosaic_0001>

<bundles_post_ra>
// kernel: next_goal_forward.1
= control target key start
LH: loop header
LB: loop body
LE: loop exit
PB: predicated region body
PF: predicated region fallthrough
CT: control target
= control target key end

     0   :  { %v1116_v0 = vmov 0.0   ;;  %vm1117_vm0 = vmmov 0   ;;  %vm74_vm1 = vcmask 261120   ;;  %s1429_s2 = inlined_call_operand.vmem [shape: bf16[32,128], index: 2, kind: input, shape index: {}]   ;;  %s1430_s0 = inlined_call_operand.vmem [shape: f32[8,32], index: 0, kind: input, shape index: {}]   ;;  %s1431_s4 = inlined_call_operand.vmem [shape: bf16[2,128,128], index: 4, kind: input, shape index: {}]   ;;  %s1432_s6 = inlined_call_operand.vmem [shape: bf16[2,128,128], index: 6, kind: input, shape index: {}]   ;;  %s1433_s3 = inlined_call_operand.vmem [shape: f32[1,128], index: 3, kind: input, shape index: {}]   ;;  %s1434_s5 = inlined_call_operand.vmem [shape: f32[2,1,128], index: 5, kind: input, shape index: {}]   ;;  %s1435_s7 = inlined_call_operand.vmem [shape: f32[2,1,128], index: 7, kind: input, shape index: {}]   ;;  %s1436_s8 = inlined_call_operand.vmem [shape: f32[2,1,128], index: 8, kind: input, shape index: {}]   ;;  %s1437_s9 = inlined_call_operand.vmem [shape: f32[2,1,128], index: 9, kind: input, shape index: {}]   ;;  %s1438_s10 = inlined_call_operand.vmem [shape: bf16[128,128], index: 10, kind: input, shape index: {}]   ;;  %s1439_s1 = inlined_call_operand.vmem [shape: f32[8,32], index: 1, kind: input, shape index: {}]   ;;  %s1440_s13 = inlined_call_operand.<no memory space> [shape: f32[1], index: 13, kind: input, shape index: {}]   ;;  %s1441_s12 = inlined_call_operand.vmem [shape: f32[1,32], index: 12, kind: input, shape index: {}]   ;;  %s1442_s11 = inlined_call_operand.vmem [shape: f32[1,128], index: 11, kind: input, shape index: {}]   ;;  %s1443_s14 = inlined_call_operand.vmem [shape: f32[8,128], index: 14, kind: output, shape index: {}]  }
   0x1   :  { %950 = vmatprep.subr.bf16.mxu0 %v1116_v0  ;;  %v1060_v1 = vld [vmem:[%s1429_s2] sm:$0xff]   ;;  %954 = vmatprep.mubr.msk.bf16.mxu0 %vm1117_vm0, %v1116_v0  ;;  %v1061_v2 = vld [vmem:[%s1429_s2 + $0x8] sm:$0xff]   ;;  %v1064_v7 = vld [vmem:[%s1431_s4 + $0x10] sm:$0xff]  }
   0x2   :  { %958 = vmatprep.subr.bf16.mxu1 %v1116_v0  ;;  %974 = vmatprep.mubr.msk.bf16.mxu1 %vm1117_vm0, %v1116_v0  ;;  %v49_v3 = vld [vmem:[%s1430_s0] sm:$0xff]  ;;  %v1063_v6 = vld [vmem:[%s1431_s4 + $0x8] sm:$0xff]   ;;  %v1065_v8 = vld [vmem:[%s1431_s4 + $0x18] sm:$0xff]  }
   0x3   :  { %951 = vmatpush3.bf16.msra.mxu0 %v1060_v1  ;;  %v1062_v4 = vld [vmem:[%s1431_s4] sm:$0xff]   ;;  %v54_v5 = vpack.c.bf16 %v49_v3, %v49_v3  ;;  %v1067_v10 = vld [vmem:[%s1431_s4 + $0x28] sm:$0xff]   ;;  %v1068_v11 = vld [vmem:[%s1431_s4 + $0x30] sm:$0xff]  }
   0x4   :  { %952 = vmatprep.subr.bf16.mxu0 %v1116_v0  ;;  %959 = vmatpush3.bf16.msra.mxu1 %v1062_v4  ;;  %v1066_v9 = vld [vmem:[%s1431_s4 + $0x20] sm:$0xff]   ;;  %v1069_v12 = vld [vmem:[%s1431_s4 + $0x38] sm:$0xff]   ;;  %v1071_v29 = vld [vmem:[%s1432_s6 + $0x8] sm:$0xff]  }
   0x5   :  { %960 = vmatprep.subr.bf16.mxu1 %v1116_v0  ;;  %v1070_v13 = vld [vmem:[%s1432_s6] sm:$0xff]   ;;  %v1072_v30 = vld [vmem:[%s1432_s6 + $0x10] sm:$0xff]   ;;  %v1073_v31 = vld [vmem:[%s1432_s6 + $0x18] sm:$0xff]  }
   0x6   :  { %v812_v14 = vld [vmem:[%s1433_s3] ss:$0 sm:$0xff]  ;;  %v1075_v33 = vld [vmem:[%s1432_s6 + $0x28] sm:$0xff]   ;;  %v1076_v34 = vld [vmem:[%s1432_s6 + $0x30] sm:$0xff]  }
   0x7   :  { %953 = vmatpush3.bf16.msra.mxu0 %v1061_v2  ;;  %v1074_v32 = vld [vmem:[%s1432_s6 + $0x20] sm:$0xff]   ;;  %v1077_v35 = vld [vmem:[%s1432_s6 + $0x38] sm:$0xff]  }
   0x8   :  { %978 = vmatprep.subr.bf16.mxu0 %v1116_v0  ;;  %961 = vmatpush3.bf16.msra.mxu1 %v1063_v6  ;;  %v816_v36 = vld [vmem:[%s1434_s5] ss:$0 sm:$0xff]  ;;  %v1080_v6 = vld [vmem:[%s1431_s4 + $0x50] sm:$0xff]  }
   0x9   :  { %962 = vmatprep.subr.bf16.mxu1 %v1116_v0  ;;  %v1078_v51 = vld [vmem:[%s1431_s4 + $0x40] sm:$0xff]  }
   0xa   :  { %955 = vmatmul.mubr.msk.bf16.vlgmr.msra.gmra.mrb[0].mxu0 %vm74_vm1, %v54_v5  ;;  %v825_v52 = vld [vmem:[%s1435_s7] ss:$0 sm:$0xff]  ;;  %v1079_v5 = vld [vmem:[%s1431_s4 + $0x48] sm:$0xff]  }
   0xb   :  { %994 = vmatprep.mubr.msk.bf16.mxu0 %vm1117_vm0, %v1116_v0  ;;  %979 = vmatpush3.bf16.msra.mxu0 %v1070_v13 }
   0xc   :  { %963 = vmatpush3.bf16.msra.mxu1 %v1064_v7  ;;  %980 = vmatprep.subr.bf16.mxu0 %v1116_v0  ;;  %v1081_v7 = vld [vmem:[%s1431_s4 + $0x58] sm:$0xff]  }
   0xd   :  { %964 = vmatprep.subr.bf16.mxu1 %v1116_v0 }
   0xf   :  { %981 = vmatpush3.bf16.msra.mxu0 %v1071_v29  ;;  %v1088_v29 = vld [vmem:[%s1432_s6 + $0x50] sm:$0xff]  }
  0x10   :  { %965 = vmatpush3.bf16.msra.mxu1 %v1065_v8  ;;  %982 = vmatprep.subr.bf16.mxu0 %v1116_v0  ;;  %v1082_v8 = vld [vmem:[%s1431_s4 + $0x60] sm:$0xff]  }
  0x11   :  { %966 = vmatprep.subr.bf16.mxu1 %v1116_v0 }
  0x13   :  { %983 = vmatpush3.bf16.msra.mxu0 %v1072_v30  ;;  %v1089_v30 = vld [vmem:[%s1432_s6 + $0x58] sm:$0xff]  }
  0x14   :  { %967 = vmatpush3.bf16.msra.mxu1 %v1066_v9  ;;  %984 = vmatprep.subr.bf16.mxu0 %v1116_v0  ;;  %v1083_v9 = vld [vmem:[%s1431_s4 + $0x68] sm:$0xff]  }
  0x15   :  { %968 = vmatprep.subr.bf16.mxu1 %v1116_v0 }
  0x17   :  { %985 = vmatpush3.bf16.msra.mxu0 %v1073_v31  ;;  %v1090_v31 = vld [vmem:[%s1432_s6 + $0x60] sm:$0xff]  }
  0x18   :  { %969 = vmatpush3.bf16.msra.mxu1 %v1067_v10  ;;  %986 = vmatprep.subr.bf16.mxu0 %v1116_v0  ;;  %v1084_v10 = vld [vmem:[%s1431_s4 + $0x70] sm:$0xff]  }
  0x19   :  { %970 = vmatprep.subr.bf16.mxu1 %v1116_v0 }
  0x1b   :  { %987 = vmatpush3.bf16.msra.mxu0 %v1074_v32  ;;  %v1091_v32 = vld [vmem:[%s1432_s6 + $0x68] sm:$0xff]  }
  0x1c   :  { %971 = vmatpush3.bf16.msra.mxu1 %v1068_v11  ;;  %988 = vmatprep.subr.bf16.mxu0 %v1116_v0  ;;  %v1085_v11 = vld [vmem:[%s1431_s4 + $0x78] sm:$0xff]  }
  0x1d   :  { %972 = vmatprep.subr.bf16.mxu1 %v1116_v0 }
  0x1f   :  { %989 = vmatpush3.bf16.msra.mxu0 %v1075_v33  ;;  %v1092_v33 = vld [vmem:[%s1432_s6 + $0x70] sm:$0xff]  }
  0x20   :  { %973 = vmatpush3.bf16.msra.mxu1 %v1069_v12  ;;  %990 = vmatprep.subr.bf16.mxu0 %v1116_v0  ;;  %v1086_v12 = vld [vmem:[%s1432_s6 + $0x40] sm:$0xff]  }
  0x21   :  { %998 = vmatprep.subr.bf16.mxu1 %v1116_v0 }
  0x23   :  { %991 = vmatpush3.bf16.msra.mxu0 %v1076_v34  ;;  %v1093_v34 = vld [vmem:[%s1432_s6 + $0x78] sm:$0xff]  }
  0x24   :  { %992 = vmatprep.subr.bf16.mxu0 %v1116_v0 }
  0x27   :  { %993 = vmatpush3.bf16.msra.mxu0 %v1077_v35  ;;  %v853_v35 = vld [vmem:[%s1434_s5 + $0x1] ss:$0 sm:$0xff] }
  0x28   :  { %1018 = vmatprep.subr.bf16.mxu0 %v1116_v0 }
  0xdd   :  { %v112_v15 = vpop.f32.mrb[0].mxu0 }
  0xde   :  { %v113_v16 = vadd.f32 %v812_v14, %v112_v15  ;;  %v956_v17 = vpop.f32.mrb[1].mxu0 }
  0xdf   :  { %v115_v18 = vpop.f32.mrb[2].mxu0 }
  0xe0   :  { %v118_v19 = vmul.f32 %v113_v16, %v113_v16  ;;  %v957_v20 = vpop.f32.mrb[3].mxu0 }
  0xe1   :  { %v834_v20 = vld [vmem:[%s1436_s8] ss:$0 sm:$0xff] }
  0xe2   :  { %v119_v21 = vmul.f32 0.035677407, %v118_v19 }
  0xe4   :  { %v120_v22 = vadd.f32 0.7978846, %v119_v21 }
  0xe6   :  { %v121_v23 = vmul.f32 %v120_v22, %v113_v16 }
  0xe8   :  { %1102 = vtanh.f32 %v121_v23 }
  0xf2   :  { %v1103_v24 = vpop.eup %1102 }
  0xf3   :  { %v123_v25 = vmul.f32 0.5, %v1103_v24  ;;  %v835_v24 = vld [vmem:[%s1437_s9] ss:$0 sm:$0xff] }
  0xf5   :  { %v124_v26 = vadd.f32 0.5, %v123_v25 }
  0xf7   :  { %v1252_v27 = vmul.f32 %v124_v26, %v113_v16 }
  0xf9   :  { %v142_v28 = vpack.c.bf16 %v1252_v27, %v1252_v27 }
  0xfb   :  { %975 = vmatmul.mubr.bf16.vlgmr.msra.gmra.mrb[0].mxu1 %v142_v28  ;;  %v1087_v28 = vld [vmem:[%s1432_s6 + $0x48] sm:$0xff]  }
  0xfc   :  { %1014 = vmatprep.mubr.msk.bf16.mxu1 %vm1117_vm0, %v1116_v0  ;;  %999 = vmatpush3.bf16.msra.mxu1 %v1078_v51  ;;  %v879_v51 = vld [vmem:[%s1435_s7 + $0x1] ss:$0 sm:$0xff] }
  0xfd   :  { %1000 = vmatprep.subr.bf16.mxu1 %v1116_v0 }
 0x100   :  { %1001 = vmatpush3.bf16.msra.mxu1 %v1079_v5  ;;  %v1096_v5 = vld [vmem:[%s1438_s10 + $0x10] sm:$0xff]  }
 0x101   :  { %1002 = vmatprep.subr.bf16.mxu1 %v1116_v0 }
 0x104   :  { %1003 = vmatpush3.bf16.msra.mxu1 %v1080_v6  ;;  %v1097_v6 = vld [vmem:[%s1438_s10 + $0x18] sm:$0xff]  }
 0x105   :  { %1004 = vmatprep.subr.bf16.mxu1 %v1116_v0 }
 0x108   :  { %1005 = vmatpush3.bf16.msra.mxu1 %v1081_v7  ;;  %v1098_v7 = vld [vmem:[%s1438_s10 + $0x20] sm:$0xff]  }
 0x109   :  { %1006 = vmatprep.subr.bf16.mxu1 %v1116_v0 }
 0x10c   :  { %1007 = vmatpush3.bf16.msra.mxu1 %v1082_v8  ;;  %v1099_v8 = vld [vmem:[%s1438_s10 + $0x28] sm:$0xff]  }
 0x10d   :  { %1008 = vmatprep.subr.bf16.mxu1 %v1116_v0 }
 0x110   :  { %1009 = vmatpush3.bf16.msra.mxu1 %v1083_v9  ;;  %v1100_v9 = vld [vmem:[%s1438_s10 + $0x30] sm:$0xff]  }
 0x111   :  { %1010 = vmatprep.subr.bf16.mxu1 %v1116_v0 }
 0x114   :  { %1011 = vmatpush3.bf16.msra.mxu1 %v1084_v10  ;;  %v1101_v10 = vld [vmem:[%s1438_s10 + $0x38] sm:$0xff]  }
 0x115   :  { %1012 = vmatprep.subr.bf16.mxu1 %v1116_v0 }
 0x118   :  { %1013 = vmatpush3.bf16.msra.mxu1 %v1085_v11  ;;  %v784_v11 = vld [vmem:[%s1439_s1] sm:$0xff] }
 0x119   :  { %1038 = vmatprep.subr.bf16.mxu1 %v1116_v0 }
 0x1ce   :  { %v232_v37 = vpop.f32.mrb[0].mxu1 }
 0x1cf   :  { %v233_v38 = vadd.f32 %v816_v36, %v232_v37  ;;  %v976_v39 = vpop.f32.mrb[1].mxu1 }
 0x1d0   :  { %v235_v40 = vpop.f32.mrb[2].mxu1 }
 0x1d1   :  { %v238_v41 = vmul.f32 %v233_v38, %v233_v38  ;;  %v977_v42 = vpop.f32.mrb[3].mxu1 }
 0x1d3   :  { %v239_v43 = vmul.f32 0.035677407, %v238_v41 }
 0x1d5   :  { %v240_v44 = vadd.f32 0.7978846, %v239_v43 }
 0x1d7   :  { %v241_v45 = vmul.f32 %v240_v44, %v233_v38 }
 0x1d9   :  { %1104 = vtanh.f32 %v241_v45 }
 0x1e3   :  { %v1105_v46 = vpop.eup %1104 }
 0x1e4   :  { %v243_v47 = vmul.f32 0.5, %v1105_v46 }
 0x1e6   :  { %v244_v48 = vadd.f32 0.5, %v243_v47 }
 0x1e8   :  { %v245_v49 = vmul.f32 %v244_v48, %v233_v38 }
 0x1ea   :  { %v262_v50 = vpack.c.bf16 %v245_v49, %v245_v49 }
 0x1ec   :  { %995 = vmatmul.mubr.bf16.vlgmr.msra.gmra.mrb[4].mxu0 %v262_v50  ;;  %v1094_v50 = vld [vmem:[%s1438_s10] sm:$0xff]  }
 0x1ed   :  { %1034 = vmatprep.mubr.msk.bf16.mxu0 %vm1117_vm0, %v1116_v0  ;;  %1019 = vmatpush3.bf16.msra.mxu0 %v1086_v12  ;;  %v793_v12 = vmul.f32 %v784_v11, %v784_v11 }
 0x1ee   :  { %1020 = vmatprep.subr.bf16.mxu0 %v1116_v0 }
 0x1f1   :  { %1021 = vmatpush3.bf16.msra.mxu0 %v1087_v28 }
 0x1f2   :  { %1022 = vmatprep.subr.bf16.mxu0 %v1116_v0 }
 0x1f5   :  { %1023 = vmatpush3.bf16.msra.mxu0 %v1088_v29  ;;  %v801_v29 = vlaneseq }
 0x1f6   :  { %1024 = vmatprep.subr.bf16.mxu0 %v1116_v0 }
 0x1f9   :  { %1025 = vmatpush3.bf16.msra.mxu0 %v1089_v30 }
 0x1fa   :  { %1026 = vmatprep.subr.bf16.mxu0 %v1116_v0 }
 0x1fd   :  { %1027 = vmatpush3.bf16.msra.mxu0 %v1090_v31  ;;  %v799_v31 = vstv %s1440_s13 }
 0x1fe   :  { %1028 = vmatprep.subr.bf16.mxu0 %v1116_v0 }
 0x201   :  { %1029 = vmatpush3.bf16.msra.mxu0 %v1091_v32  ;;  %v901_v32 = vld [vmem:[%s1441_s12] ss:$0 sm:$0xff] }
 0x202   :  { %1030 = vmatprep.subr.bf16.mxu0 %v1116_v0 }
 0x205   :  { %1031 = vmatpush3.bf16.msra.mxu0 %v1092_v33  ;;  %v802_v33 = vand.u32 127, %v801_v29 }
 0x206   :  { %1032 = vmatprep.subr.bf16.mxu0 %v1116_v0 }
 0x207   :  { %vm803_vm2 = vcmp.eq.s32.totalorder %v802_v33, 32 }
 0x209   :  { %1033 = vmatpush3.bf16.msra.mxu0 %v1093_v34  ;;  %v892_v34 = vld [vmem:[%s1442_s11] ss:$0 sm:$0xff] }
 0x2bf   :  { %v352_v53 = vpop.f32.mrb[4].mxu0 }
 0x2c0   :  { %v353_v54 = vadd.f32 %v825_v52, %v352_v53  ;;  %v996_v55 = vpop.f32.mrb[5].mxu0 }
 0x2c1   :  { %v355_v56 = vpop.f32.mrb[6].mxu0 }
 0x2c2   :  { %v358_v57 = vmul.f32 %v353_v54, %v353_v54  ;;  %v997_v58 = vpop.f32.mrb[7].mxu0 }
 0x2c4   :  { %v359_v59 = vmul.f32 0.035677407, %v358_v57 }
 0x2c6   :  { %v360_v60 = vadd.f32 0.7978846, %v359_v59 }
 0x2c8   :  { %v361_v61 = vmul.f32 %v360_v60, %v353_v54 }
 0x2ca   :  { %1106 = vtanh.f32 %v361_v61 }
 0x2d4   :  { %v1107_v62 = vpop.eup %1106 }
 0x2d5   :  { %v363_v63 = vmul.f32 0.5, %v1107_v62 }
 0x2d7   :  { %v364_v1 = vadd.f32 0.5, %v363_v63 }
 0x2d9   :  { %v365_v2 = vmul.f32 %v364_v1, %v353_v54 }
 0x2db   :  { %v366_v3 = vadd.f32 %v365_v2, %v1252_v27 }
 0x2dd   :  { %369 = vadd.xlane.f32.xlu0 %v366_v3  ;;  %v372_v4 = vmul.f32 %v366_v3, %v366_v3 }
 0x2e1   :  { %373 = vadd.xlane.f32.xlu0 %v372_v4  ;;  %v1095_v4 = vld [vmem:[%s1438_s10 + $0x8] sm:$0xff]  }
 0x36a   :  { %v370_v13 = vpop.xlane.xlu0 %369 }
 0x36b   :  { %v371_v14 = vmul.f32 0.0078125, %v370_v13  ;;  %v794_v13 = vsel %vm74_vm1, %v793_v12, 0.0 }
 0x36c   :  { %795 = vadd.xlane.f32.xlu0 %v794_v13 }
 0x36d   :  { %v376_v16 = vmul.f32 %v371_v14, %v371_v14  ;;  %v380_v22 = vsub.f32 %v366_v3, %v371_v14 }
 0x36e   :  { %v374_v15 = vpop.xlane.xlu0 %373 }
 0x36f   :  { %v375_v17 = vmul.f32 0.0078125, %v374_v15 }
 0x371   :  { %v377_v18 = vsub.f32 %v375_v17, %v376_v16 }
 0x373   :  { %v378_v19 = vadd.f32 1e-05, %v377_v18 }
 0x375   :  { %1108 = vrsqrt.f32 %v378_v19 }
 0x37f   :  { %v1109_v21 = vpop.eup %1108 }
 0x380   :  { %v387_v23 = vmul.f32 %v1109_v21, %v834_v20 }
 0x382   :  { %v388_v25 = vmul.f32 %v387_v23, %v380_v22 }
 0x384   :  { %v395_v26 = vadd.f32 %v835_v24, %v388_v25  ;;  %v891_v24 = vld [vmem:[%s1437_s9 + $0x1] ss:$0 sm:$0xff] }
 0x386   :  { %v413_v27 = vpack.c.bf16 %v395_v26, %v395_v26 }
 0x388   :  { %1015 = vmatmul.mubr.bf16.vlgmr.msra.gmra.mrb[4].mxu1 %v413_v27 }
 0x389   :  { %1054 = vmatprep.mubr.msk.bf16.mxu1 %vm1117_vm0, %v1116_v0  ;;  %1039 = vmatpush3.bf16.msra.mxu1 %v1094_v50 }
 0x38a   :  { %1040 = vmatprep.subr.bf16.mxu1 %v1116_v0 }
 0x38d   :  { %1041 = vmatpush3.bf16.msra.mxu1 %v1095_v4 }
 0x38e   :  { %1042 = vmatprep.subr.bf16.mxu1 %v1116_v0 }
 0x391   :  { %1043 = vmatpush3.bf16.msra.mxu1 %v1096_v5 }
 0x392   :  { %1044 = vmatprep.subr.bf16.mxu1 %v1116_v0 }
 0x395   :  { %1045 = vmatpush3.bf16.msra.mxu1 %v1097_v6 }
 0x396   :  { %1046 = vmatprep.subr.bf16.mxu1 %v1116_v0 }
 0x399   :  { %1047 = vmatpush3.bf16.msra.mxu1 %v1098_v7 }
 0x39a   :  { %1048 = vmatprep.subr.bf16.mxu1 %v1116_v0 }
 0x39d   :  { %1049 = vmatpush3.bf16.msra.mxu1 %v1099_v8 }
 0x39e   :  { %1050 = vmatprep.subr.bf16.mxu1 %v1116_v0 }
 0x3a1   :  { %1051 = vmatpush3.bf16.msra.mxu1 %v1100_v9 }
 0x3a2   :  { %1052 = vmatprep.subr.bf16.mxu1 %v1116_v0  ;;  %v890_v0 = vld [vmem:[%s1436_s8 + $0x1] ss:$0 sm:$0xff] }
 0x3a5   :  { %1053 = vmatpush3.bf16.msra.mxu1 %v1101_v10 }
 0x3f9   :  { %v796_v28 = vpop.xlane.xlu0 %795 }
 0x3fa   :  { %v797_v30 = vmul.f32 -0.5, %v796_v28 }
 0x45b   :  { %v504_v36 = vpop.f32.mrb[4].mxu1 }
 0x45c   :  { %v505_v37 = vadd.f32 %v853_v35, %v504_v36  ;;  %v1016_v38 = vpop.f32.mrb[5].mxu1  ;;  %v800_v35 = vadd.f32 %v799_v31, %v797_v30  ;;  %v792_v36 = vmul.f32 %v901_v32, %v784_v11 }
 0x45d   :  { %v507_v39 = vpop.f32.mrb[6].mxu1 }
 0x45e   :  { %v510_v40 = vmul.f32 %v505_v37, %v505_v37  ;;  %v1017_v41 = vpop.f32.mrb[7].mxu1 }
 0x460   :  { %v511_v42 = vmul.f32 0.035677407, %v510_v40 }
 0x462   :  { %v512_v43 = vadd.f32 0.7978846, %v511_v42 }
 0x464   :  { %v513_v44 = vmul.f32 %v512_v43, %v505_v37 }
 0x466   :  { %1110 = vtanh.f32 %v513_v44 }
 0x470   :  { %v1111_v45 = vpop.eup %1110 }
 0x471   :  { %v515_v46 = vmul.f32 0.5, %v1111_v45 }
 0x473   :  { %v516_v47 = vadd.f32 0.5, %v515_v46 }
 0x475   :  { %v517_v48 = vmul.f32 %v516_v47, %v505_v37 }
 0x477   :  { %v535_v49 = vpack.c.bf16 %v517_v48, %v517_v48 }
 0x479   :  { %1035 = vmatmul.mubr.bf16.vlgmr.msra.gmra.mrb[8].mxu0 %v535_v49 }
 0x54c   :  { %v626_v52 = vpop.f32.mrb[8].mxu0 }
 0x54d   :  { %v627_v53 = vadd.f32 %v879_v51, %v626_v52  ;;  %v1036_v54 = vpop.f32.mrb[9].mxu0 }
 0x54e   :  { %v629_v55 = vpop.f32.mrb[10].mxu0 }
 0x54f   :  { %v632_v56 = vmul.f32 %v627_v53, %v627_v53  ;;  %v1037_v57 = vpop.f32.mrb[11].mxu0 }
 0x551   :  { %v633_v58 = vmul.f32 0.035677407, %v632_v56 }
 0x553   :  { %v634_v59 = vadd.f32 0.7978846, %v633_v58 }
 0x555   :  { %v635_v60 = vmul.f32 %v634_v59, %v627_v53 }
 0x557   :  { %1112 = vtanh.f32 %v635_v60 }
 0x561   :  { %v1113_v61 = vpop.eup %1112 }
 0x562   :  { %v637_v62 = vmul.f32 0.5, %v1113_v61 }
 0x564   :  { %v638_v63 = vadd.f32 0.5, %v637_v62 }
 0x566   :  { %v639_v1 = vmul.f32 %v638_v63, %v627_v53 }
 0x568   :  { %v640_v2 = vadd.f32 %v639_v1, %v395_v26 }
 0x56a   :  { %645 = vadd.xlane.f32.xlu1 %v640_v2  ;;  %v648_v3 = vmul.f32 %v640_v2, %v640_v2 }
 0x56e   :  { %649 = vadd.xlane.f32.xlu1 %v648_v3 }
 0x5f7   :  { %v646_v14 = vpop.xlane.xlu1 %645 }
 0x5f8   :  { %v647_v15 = vmul.f32 0.0078125, %v646_v14 }
 0x5fa   :  { %v652_v17 = vmul.f32 %v647_v15, %v647_v15  ;;  %v656_v22 = vsub.f32 %v640_v2, %v647_v15 }
 0x5fb   :  { %v650_v16 = vpop.xlane.xlu1 %649 }
 0x5fc   :  { %v651_v18 = vmul.f32 0.0078125, %v650_v16 }
 0x5fe   :  { %v653_v19 = vsub.f32 %v651_v18, %v652_v17 }
 0x600   :  { %v654_v20 = vadd.f32 1e-05, %v653_v19 }
 0x602   :  { %1114 = vrsqrt.f32 %v654_v20 }
 0x60c   :  { %v1115_v21 = vpop.eup %1114 }
 0x60d   :  { %v663_v23 = vmul.f32 %v1115_v21, %v890_v0 }
 0x60f   :  { %v664_v25 = vmul.f32 %v663_v23, %v656_v22 }
 0x611   :  { %v671_v26 = vadd.f32 %v891_v24, %v664_v25 }
 0x613   :  { %v688_v27 = vpack.c.bf16 %v671_v26, %v671_v26 }
 0x615   :  { %1055 = vmatmul.mubr.bf16.vlgmr.msra.gmra.mrb[8].mxu1 %v688_v27 }
 0x6e8   :  { %v778_v37 = vpop.f32.mrb[8].mxu1 }
 0x6e9   :  { %v779_v38 = vadd.f32 %v892_v34, %v778_v37  ;;  %v1056_v39 = vpop.f32.mrb[9].mxu1 }
 0x6ea   :  { %v781_v40 = vpop.f32.mrb[10].mxu1 }
 0x6eb   :  { %v804_v41 = vsel %vm803_vm2, %v800_v35, %v779_v38  ;;  %v806_v42 = vadd.f32 %v792_v36, %v779_v38  ;;  %v1057_v43 = vpop.f32.mrb[11].mxu1 }
 0x6ec   :  { %805 = vst [vmem:[%s1443_s14] sm:$0xff] %v804_v41 }
 0x6ed   :  { %807 = vst.msk [vmem:[%s1443_s14] sm:$0xff] %vm74_vm1, %v806_v42 }

</bundles_post_ra>
